<compile_context>
chip_gen: v7x
topology: tpu7x:2x2x1
jax: 0.10.0
libtpu: 0.0.40
codegen_flags: <defaults>
</compile_context>

<pallas_src>
import functools

import jax
import jax.numpy as jnp
from jax.experimental import pallas as pl
from jax.experimental.pallas import tpu as pltpu


def classifier_kernel(img_ref, w_enc_ref, b_enc_ref, w_cls_ref, b_cls_ref,
                      out_ref, acc_ref, *, inv_hw, hw, tile_hw):
    """Fused stand-in encoder (1x1 conv) -> ReLU -> global avg pool -> linear head.

    Grid = (B, HW_tiles); HW is a reduction accumulated into acc_ref.

    img_ref  : [1, Cin, tile_hw]  f32   (NCHW layout, HW on the lane axis)
    w_enc_ref: [Cf, Cin]          bf16  (encoder weight, pre-transposed)
    b_enc_ref: [Cf, 1]            f32
    w_cls_ref: [Cf, NCp]          f32   (head weight transposed + lane-padded)
    b_cls_ref: [1, NCp]           f32
    out_ref  : [1, 1, NCp]        f32
    acc_ref  : [Cf, 128]          f32   (per-batch lane-sharded channel-sum accumulator)
    """
    k = pl.program_id(1)

    @pl.when(k == 0)
    def _():
        acc_ref[...] = jnp.zeros_like(acc_ref)

    # Image arrives f32 directly from HBM (single pass); cast to bf16 here for the
    # MXU -- the VPU cast is hidden under the next tile's DMA.
    x = img_ref[0].astype(jnp.bfloat16)                        # [Cin, tile_hw]
    feats = jnp.dot(w_enc_ref[...], x,
                    preferred_element_type=jnp.float32)        # [Cf, tile_hw] f32
    feats = jnp.maximum(feats + b_enc_ref[...], 0.0)           # bias + ReLU (f32)

    # Tail-tile mask (only emitted when HW % tile_hw != 0): must zero masked lanes
    # AFTER bias+ReLU so padded lanes never leak bias-derived values into the mean.
    if hw % tile_hw != 0:
        col = jax.lax.broadcasted_iota(jnp.int32, (1, tile_hw), 1)
        feats = jnp.where(k * tile_hw + col < hw, feats, 0.0)

    # Lane-aligned partial pooling: accumulate 128-lane slabs with VALU adds only
    # (static slices, no relayout); overlaps the next chunk's DMA.
    acc = acc_ref[...]
    for i in range(tile_hw // 128):
        acc = acc + feats[:, i * 128:(i + 1) * 128]
    acc_ref[...] = acc

    @pl.when(k == pl.num_programs(1) - 1)
    def _():
        # Single 128 -> 1 cross-lane reduce, then mean over the true HW.
        pooled = jnp.sum(acc_ref[...], axis=1, keepdims=True) * inv_hw   # [Cf, 1]
        # Linear head: broadcast-multiply + sublane reduce (tiny; transpose-free).
        logits = (jnp.sum(pooled * w_cls_ref[...], axis=0, keepdims=True)
                  + b_cls_ref[...])                                      # [1, NCp]
        out_ref[...] = logits.reshape(out_ref.shape).astype(out_ref.dtype)


def _derive_tile_hw(hw, cin, cf, *, budget_bytes=24 * 1024 * 1024, tile_cap=8192):
    """Largest 128-aligned lane tile whose working set stays under the VMEM budget.

    Per-lane VMEM cost: f32 img (double-buffered) + in-kernel bf16 copy + f32 feats.
    Budget ~24 MiB keeps the tile safe on v7x (64 MiB VMEM); v5e/v6e fit trivially.
    """
    hw_pad = ((hw + 127) // 128) * 128
    per_lane = 2 * cin * 4 + cin * 2 + cf * 4
    max_tile = max(((budget_bytes // per_lane) // 128) * 128, 128)
    return min(tile_cap, hw_pad, max_tile)


def classifier_forward(img_nchw, w_enc, b_enc, w_cls, b_cls, *, tile_hw=None):
    """img_nchw: [B, Cin, H, W] float32. Returns logits [B, num_classes] float32."""
    B, Cin, H, W = img_nchw.shape
    HW = H * W
    Cf = w_enc.shape[1]
    NC = w_cls.shape[0]
    NCp = ((NC + 127) // 128) * 128                 # lane-pad the class dim

    # Keep NCHW and f32 (no wrapper transpose/cast HBM pass): kernel sees
    # [B, Cin, HW] with HW on the lane axis; the bf16 cast happens in-kernel.
    img = img_nchw.reshape(B, Cin, HW)
    w_enc_t = w_enc.T.astype(jnp.bfloat16)                       # [Cf, Cin]
    b_enc_c = b_enc.reshape(Cf, 1).astype(jnp.float32)           # [Cf, 1]
    w_cls_p = jnp.zeros((Cf, NCp), jnp.float32).at[:, :NC].set(
        w_cls.T.astype(jnp.float32))                             # [Cf, NCp]
    b_cls_p = jnp.zeros((1, NCp), jnp.float32).at[:, :NC].set(
        b_cls.astype(jnp.float32))                               # [1, NCp]

    if tile_hw is None:
        tile_hw = _derive_tile_hw(HW, Cin, Cf)
    n_hw = -(-HW // tile_hw)                        # cdiv; tail tile masked in-kernel

    kernel = functools.partial(classifier_kernel,
                               inv_hw=1.0 / HW, hw=HW, tile_hw=tile_hw)

    out = pl.pallas_call(
        kernel,
        out_shape=jax.ShapeDtypeStruct((B, 1, NCp), jnp.float32),
        grid_spec=pltpu.PrefetchScalarGridSpec(
            num_scalar_prefetch=0,
            grid=(B, n_hw),                         # batch parallel, HW reduction last
            in_specs=[
                pl.BlockSpec((1, Cin, tile_hw), lambda b, k: (b, 0, k)),
                pl.BlockSpec((Cf, Cin), lambda b, k: (0, 0)),
                pl.BlockSpec((Cf, 1), lambda b, k: (0, 0)),
                pl.BlockSpec((Cf, NCp), lambda b, k: (0, 0)),
                pl.BlockSpec((1, NCp), lambda b, k: (0, 0)),
            ],
            out_specs=pl.BlockSpec((1, 1, NCp), lambda b, k: (b, 0, 0)),
            scratch_shapes=[pltpu.VMEM((Cf, 128), jnp.float32)],
        ),
        compiler_params=pltpu.CompilerParams(
            dimension_semantics=("parallel", "arbitrary"),
            vmem_limit_bytes=32 * 1024 * 1024,
        ),
    )(img, w_enc_t, b_enc_c, w_cls_p, b_cls_p)

    return out[:, 0, :NC]


if __name__ == "__main__":
    # Small shapes consistent with the module's forward (NCHW input as PyTorch supplies).
    B, Cin, H, W = 2, 4, 16, 16
    Cf = 128                           # stand-in for resnet `inplanes`
    NUM_CLASSES = 10

    key = jax.random.PRNGKey(0)
    k_img, k_wenc, k_wcls = jax.random.split(key, 3)

    img = jax.random.normal(k_img, (B, Cin, H, W), dtype=jnp.float32)

    # Stand-in encoder params (deterministic).
    w_enc = jax.random.normal(k_wenc, (Cin, Cf), dtype=jnp.float32) * 0.1
    b_enc = jnp.zeros((Cf,), dtype=jnp.float32)

    # Classifier head per _initialize_weights: normal(0, 0.01) weight, zero bias.
    w_cls = jax.random.normal(k_wcls, (NUM_CLASSES, Cf), dtype=jnp.float32) * 0.01
    b_cls = jnp.zeros((NUM_CLASSES,), dtype=jnp.float32)

    logits = classifier_forward(img, w_enc, b_enc, w_cls, b_cls)
    jax.block_until_ready(logits)

    # Pure-JAX reference (mirrors the kernel's bf16 quantization of the encoder
    # matmul operands; accumulation and everything downstream in f32).
    img_q = img.astype(jnp.bfloat16).astype(jnp.float32)
    w_enc_q = w_enc.astype(jnp.bfloat16).astype(jnp.float32)
    feats_ref = jax.nn.relu(
        jnp.einsum("bchw,cf->bhwf", img_q, w_enc_q,
                   precision=jax.lax.Precision.HIGHEST) + b_enc)     # [B,H,W,Cf]
    pooled_ref = feats_ref.mean(axis=(1, 2))                         # [B,Cf]
    logits_ref = jnp.dot(pooled_ref, w_cls.T,
                         precision=jax.lax.Precision.HIGHEST) + b_cls

    assert logits.shape == (B, NUM_CLASSES)
    assert jnp.allclose(logits, logits_ref, atol=1e-4, rtol=1e-4), (
        float(jnp.max(jnp.abs(logits - logits_ref))))

    print("KERNEL_OK")
</pallas_src>

<mosaic_0001>
module attributes {stable_mosaic.version = 11 : i64} {
  func.func @classifier_kernel(%arg0: i32, %arg1: i32, %arg2: memref<1x4x256xf32, #tpu.memory_space<vmem>>, %arg3: memref<128x4xbf16, #tpu.memory_space<vmem>>, %arg4: memref<128x1xf32, #tpu.memory_space<vmem>>, %arg5: memref<128x128xf32, #tpu.memory_space<vmem>>, %arg6: memref<1x128xf32, #tpu.memory_space<vmem>>, %arg7: memref<1x1x128xf32, #tpu.memory_space<vmem>>, %arg8: memref<128x128xf32, #tpu.memory_space<vmem>>) attributes {dimension_semantics = [#tpu.dimension_semantics<parallel>, #tpu.dimension_semantics<arbitrary>], iteration_bounds = array<i64: 2, 1>, scalar_prefetch = 0 : i64, scratch_operands = 1 : i64, tpu.core_type = #tpu.core_type<tc>, window_params = [{transform_indices = @transform_0, window_bounds = array<i64: 1, 4, 256>}, {pipeline_mode = #tpu.pipeline_mode<synchronous>, transform_indices = @transform_1, window_bounds = array<i64: 128, 4>}, {pipeline_mode = #tpu.pipeline_mode<synchronous>, transform_indices = @transform_2, window_bounds = array<i64: 128, 1>}, {pipeline_mode = #tpu.pipeline_mode<synchronous>, transform_indices = @transform_3, window_bounds = array<i64: 128, 128>}, {pipeline_mode = #tpu.pipeline_mode<synchronous>, transform_indices = @transform_4, window_bounds = array<i64: 1, 128>}, {transform_indices = @transform_5, window_bounds = array<i64: 1, 1, 128>}]} {
    %c0_i32 = arith.constant 0 : i32
    %0 = arith.cmpi eq, %arg1, %c0_i32 : i32
    %1 = arith.extui %0 : i1 to i32
    %c0_i32_0 = arith.constant 0 : i32
    %2 = arith.cmpi ne, %1, %c0_i32_0 : i32
    scf.if %2 {
      %cst_14 = arith.constant 0.000000e+00 : f32
      %22 = vector.broadcast %cst_14 : f32 to vector<128x128xf32>
      %c0_15 = arith.constant 0 : index
      %c0_16 = arith.constant 0 : index
      %23 = vector.load %arg8[%c0_15, %c0_16] : memref<128x128xf32, #tpu.memory_space<vmem>>, vector<128x128xf32>
      tpu.vector_store %arg8[%c0_15, %c0_16], %22 {strides = array<i32>} : memref<128x128xf32, #tpu.memory_space<vmem>>, vector<128x128xf32>,
    } else {
    }
    %c0 = arith.constant 0 : index
    %c0_1 = arith.constant 0 : index
    %c0_2 = arith.constant 0 : index
    %3 = vector.load %arg2[%c0, %c0_1, %c0_2] : memref<1x4x256xf32, #tpu.memory_space<vmem>>, vector<1x4x256xf32>
    %4 = vector.shape_cast %3 : vector<1x4x256xf32> to vector<4x256xf32>
    %5 = arith.truncf %4 : vector<4x256xf32> to vector<4x256xbf16>
    %c0_3 = arith.constant 0 : index
    %c0_4 = arith.constant 0 : index
    %6 = vector.load %arg3[%c0_3, %c0_4] : memref<128x4xbf16, #tpu.memory_space<vmem>>, vector<128x4xbf16>
    %cst = arith.constant dense<0.000000e+00> : vector<128x256xf32>
    %7 = tpu.matmul %6, %5, %cst {dimension_numbers = #tpu.dot_dimension_numbers<[1], [0], [0], [1], [0, 0, 1, 1], [], []>} : vector<128x4xbf16>, vector<4x256xbf16>, vector<128x256xf32> -> vector<128x256xf32>
    %c0_5 = arith.constant 0 : index
    %c0_6 = arith.constant 0 : index
    %8 = vector.load %arg4[%c0_5, %c0_6] : memref<128x1xf32, #tpu.memory_space<vmem>>, vector<128x1xf32>
    %9 = vector.broadcast %8 : vector<128x1xf32> to vector<128x256xf32>
    %10 = arith.addf %7, %9 : vector<128x256xf32>
    %cst_7 = arith.constant 0.000000e+00 : f32
    %11 = vector.broadcast %cst_7 : f32 to vector<128x256xf32>
    %12 = arith.maximumf %10, %11 : vector<128x256xf32>
    %c0_8 = arith.constant 0 : index
    %c0_9 = arith.constant 0 : index
    %13 = vector.load %arg8[%c0_8, %c0_9] : memref<128x128xf32, #tpu.memory_space<vmem>>, vector<128x128xf32>
    %14 = vector.extract_strided_slice %12 {offsets = [0, 0], sizes = [128, 128], strides = [1, 1]} : vector<128x256xf32> to vector<128x128xf32>
    %15 = arith.addf %13, %14 : vector<128x128xf32>
    %16 = vector.extract_strided_slice %12 {offsets = [0, 128], sizes = [128, 128], strides = [1, 1]} : vector<128x256xf32> to vector<128x128xf32>
    %17 = arith.addf %15, %16 : vector<128x128xf32>
    %c0_10 = arith.constant 0 : index
    %c0_11 = arith.constant 0 : index
    %18 = vector.load %arg8[%c0_10, %c0_11] : memref<128x128xf32, #tpu.memory_space<vmem>>, vector<128x128xf32>
    tpu.vector_store %arg8[%c0_10, %c0_11], %17 {strides = array<i32>} : memref<128x128xf32, #tpu.memory_space<vmem>>, vector<128x128xf32>,
    %c0_i32_12 = arith.constant 0 : i32
    %19 = arith.cmpi eq, %arg1, %c0_i32_12 : i32
    %20 = arith.extui %19 : i1 to i32
    %c0_i32_13 = arith.constant 0 : i32
    %21 = arith.cmpi ne, %20, %c0_i32_13 : i32
    scf.if %21 {
      %c0_14 = arith.constant 0 : index
      %c0_15 = arith.constant 0 : index
      %22 = vector.load %arg8[%c0_14, %c0_15] : memref<128x128xf32, #tpu.memory_space<vmem>>, vector<128x128xf32>
      %cst_16 = arith.constant dense<0.000000e+00> : vector<128xf32>
      %23 = vector.multi_reduction <add>, %22, %cst_16 [1] : vector<128x128xf32> to vector<128xf32>
      %24 = vector.shape_cast %23 : vector<128xf32> to vector<128x1xf32>
      %cst_17 = arith.constant 3.906250e-03 : f32
      %25 = vector.broadcast %cst_17 : f32 to vector<128x1xf32>
      %26 = arith.mulf %24, %25 : vector<128x1xf32>
      %c0_18 = arith.constant 0 : index
      %c0_19 = arith.constant 0 : index
      %27 = vector.load %arg5[%c0_18, %c0_19] : memref<128x128xf32, #tpu.memory_space<vmem>>, vector<128x128xf32>
      %28 = vector.broadcast %26 : vector<128x1xf32> to vector<128x128xf32>
      %29 = arith.mulf %28, %27 : vector<128x128xf32>
      %cst_20 = arith.constant dense<0.000000e+00> : vector<128xf32>
      %30 = vector.multi_reduction <add>, %29, %cst_20 [0] : vector<128x128xf32> to vector<128xf32>
      %31 = vector.shape_cast %30 : vector<128xf32> to vector<1x128xf32>
      %c0_21 = arith.constant 0 : index
      %c0_22 = arith.constant 0 : index
      %32 = vector.load %arg6[%c0_21, %c0_22] : memref<1x128xf32, #tpu.memory_space<vmem>>, vector<1x128xf32>
      %33 = arith.addf %31, %32 : vector<1x128xf32>
      %34 = vector.shape_cast %33 : vector<1x128xf32> to vector<1x1x128xf32>
      %c0_23 = arith.constant 0 : index
      %c0_24 = arith.constant 0 : index
      %c0_25 = arith.constant 0 : index
      %35 = vector.load %arg7[%c0_23, %c0_24, %c0_25] : memref<1x1x128xf32, #tpu.memory_space<vmem>>, vector<1x1x128xf32>
      tpu.vector_store %arg7[%c0_23, %c0_24, %c0_25], %34 {strides = array<i32>} : memref<1x1x128xf32, #tpu.memory_space<vmem>>, vector<1x1x128xf32>,
    } else {
    }
    return
  }
  func.func @transform_0(%arg0: i32, %arg1: i32) -> (i32, i32, i32) {
    %c0_i32 = arith.constant 0 : i32
    %c0_i32_0 = arith.constant 0 : i32
    return %arg0, %c0_i32, %arg1 : i32, i32, i32
  }
  func.func @transform_1(%arg0: i32, %arg1: i32) -> (i32, i32) {
    %c0_i32 = arith.constant 0 : i32
    %c0_i32_0 = arith.constant 0 : i32
    %c0_i32_1 = arith.constant 0 : i32
    return %c0_i32, %c0_i32_0 : i32, i32
  }
  func.func @transform_2(%arg0: i32, %arg1: i32) -> (i32, i32) {
    %c0_i32 = arith.constant 0 : i32
    %c0_i32_0 = arith.constant 0 : i32
    %c0_i32_1 = arith.constant 0 : i32
    return %c0_i32, %c0_i32_0 : i32, i32
  }
  func.func @transform_3(%arg0: i32, %arg1: i32) -> (i32, i32) {
    %c0_i32 = arith.constant 0 : i32
    %c0_i32_0 = arith.constant 0 : i32
    %c0_i32_1 = arith.constant 0 : i32
    return %c0_i32, %c0_i32_0 : i32, i32
  }
  func.func @transform_4(%arg0: i32, %arg1: i32) -> (i32, i32) {
    %c0_i32 = arith.constant 0 : i32
    %c0_i32_0 = arith.constant 0 : i32
    %c0_i32_1 = arith.constant 0 : i32
    return %c0_i32, %c0_i32_0 : i32, i32
  }
  func.func @transform_5(%arg0: i32, %arg1: i32) -> (i32, i32, i32) {
    %c0_i32 = arith.constant 0 : i32
    %c0_i32_0 = arith.constant 0 : i32
    %c0_i32_1 = arith.constant 0 : i32
    return %arg0, %c0_i32, %c0_i32_0 : i32, i32, i32
  }
}

</mosaic_0001>

<bundles_post_ra>
// kernel: tpu_custom_call.1
= control target key start
LH: loop header
LB: loop body
LE: loop exit
PB: predicated region body
PF: predicated region fallthrough
CT: control target
= control target key end

     0   :  { %10 = vsyncpa [#allocation4], 0  ;;  %s1355_s0 = inlined_call_operand.vmem [shape: f32[2,4,256], index: 0, kind: input, shape index: {}]   ;;  %s1356_s1 = inlined_call_operand.vmem [shape: bf16[128,4], index: 1, kind: input, shape index: {}]   ;;  %s1357_s2 = inlined_call_operand.vmem [shape: f32[128,1], index: 2, kind: input, shape index: {}]   ;;  %s1358_s3 = inlined_call_operand.vmem [shape: f32[128,128], index: 3, kind: input, shape index: {}]   ;;  %s1359_s4 = inlined_call_operand.vmem [shape: f32[1,128], index: 4, kind: input, shape index: {}]   ;;  %s1360_s5 = inlined_call_operand.hbm [shape: f32[2,1,128], index: 5, kind: output, shape index: {}]  }
   0x1   :  { %12 = vsyncpa [#allocation4 + $0x1], 0  ;;  %s1084_s18 = smov 0   ;;  %s1086_s19 = smov 0  }
   0x2   :  { %s1088_s20 = smov 0   ;;  %s1090_s21 = smov 0  }
   0x3   :  { %s1092_s22 = smov 0   ;;  %s1094_s23 = smov 0  }
   0x4 LB: > { %s875_s24 = sadd.s32 4294967295, %s1050_s23   ;;  %s876_s25 = sadd.s32 4294967294, %s1050_s23   ;;  %s1050_s23 = sphi %s1094_s23, %s18_s23   ;;  %s1046_s22 = sphi %s1092_s22, %s1367_s22   ;;  %s1042_s21 = sphi %s1090_s21, %s1366_s21   ;;  %s1038_s20 = sphi %s1088_s20, %s1365_s20   ;;  %s1034_s19 = sphi %s1086_s19, %s1364_s19   ;;  %s1030_s18 = sphi %s1084_s18, %s1363_s18  }
   0x5   : > { %s30_s26 = sadd.s32 1, %s1046_s22  ;;  %s149_s27 = sadd.s32 1, %s1038_s20 }
   0x6   : > { %p32_p0 = scmp.ge.s32.totalorder %s30_s26, 2  ;;  %p159_p1 = scmp.ne.s32.totalorder %s1038_s20, %s1034_s19 }
   0x7   : > { %p160_p2 = scmp.eq.s32.totalorder %s875_s24, 1  ;;  %p165_p3 = scmp.ne.s32.totalorder %s1034_s19, %s1030_s18 }
   0x8   : > { %s1369_s26 = smov (%p32_p0, %s30_s26), 0  ;;  %p166_p5 = scmp.eq.s32.totalorder %s876_s25, 1 }
   0x9   : > { %p1124_p4 = por %p160_p2, %p159_p1  ;;  %s146_s29 = ssub.s32 %s1046_s22, %s1369_s26 }
   0xa   : > { %p879_p6 = scmp.ge.s32.totalorder %s1050_s23, 1  ;;  %p147_p7 = scmp.eq.s32.totalorder %s146_s29, 0 }
   0xb   : > { %p1131_p8 = por %p166_p5, %p165_p3  ;;  %p209_p9 = scmp.lt.s32.totalorder %s1050_s23, 3 }
   0xc   : > { %s1137_s6 = scalar_select %p147_p7, %s1038_s20, %s149_s27  }
   0xd   : > { %p210_p10 = pnand %p879_p6, %p209_p9 }
   0xe   : > { %p241_p11 = scmp.lt.s32.totalorder (!%p210_p10), %s1042_s21, 1  ;;  %v1052_v0 = vmov (!%p210_p10), 0   ;;  %vm454_vm0 = vcmask (!%p210_p10), 1041408   ;;  %v293_v4 = vld [vmem:[%s1357_s2] sm:$0xff] (!%p210_p10)  ;;  %v295_v7 = vld [vmem:[%s1357_s2 + $0x10] sm:$0xff] (!%p210_p10)  ;;  %v294_v8 = vld [vmem:[%s1357_s2 + $0x8] sm:$0xff] (!%p210_p10) }
   0xf   : > { %213 = sbr.rel (%p210_p10) target bundleno = 472 (0x1d8), region = 40  ;;  %493 = vmatprep.mubr.bf16.mxu0 (!%p210_p10), %v1052_v0  ;;  %533 = vmatprep.mubr.bf16.mxu1 (!%p210_p10), %v1052_v0  ;;  %v964_v9 = vld [vmem:[%s1356_s1] sm:$0xff] (!%p210_p10)   ;;  %v296_v11 = vld [vmem:[%s1357_s2 + $0x18] sm:$0xff] (!%p210_p10)  ;;  %vm429_vm1 = vcmask (!%p210_p10), 31744   ;;  %v298_v13 = vld [vmem:[%s1357_s2 + $0x28] sm:$0xff] (!%p210_p10)  ;;  %s238_s17 = sand.u32 (!%p210_p10), 1, %s1034_s19  }
  0x10   : > { %961 = vset.pattern.permute.xlu0 (!%p210_p10), %v1052_v0  ;;  %962 = vset.pattern.permute.xlu1 (!%p210_p10), %v1052_v0  ;;  %v965_v10 = vld [vmem:[%s1356_s1 + $0x20] sm:$0xff] (!%p210_p10)   ;;  %v299_v14 = vld [vmem:[%s1357_s2 + $0x30] sm:$0xff] (!%p210_p10)  ;;  %v966_v15 = vld [vmem:[%s1356_s1 + $0x8] sm:$0xff] (!%p210_p10)   ;;  %s899_s27 = sshll.u32 (!%p210_p10), %s1042_s21, 4  ;;  %s239_s29 = scalar_lea.vmem (!%p210_p10), [#allocation3], %s238_s17 }
  0x11   : > { %311 = vperm.xlu0 (!%p210_p10), %961, %v293_v4   ;;  %321 = vperm.xlu1 (!%p210_p10), %962, %v295_v7   ;;  %v297_v12 = vld [vmem:[%s1357_s2 + $0x20] sm:$0xff] (!%p210_p10)  ;;  %v967_v16 = vld [vmem:[%s1356_s1 + $0x28] sm:$0xff] (!%p210_p10)   ;;  %v300_v17 = vld [vmem:[%s1357_s2 + $0x38] sm:$0xff] (!%p210_p10)  ;;  %s1308_s10 = scalar_lea.hbm (!%p210_p10), %s1360_s5, %s899_s27 }
  0x12   : > { %v301_v18 = vld [vmem:[%s1357_s2 + $0x40] sm:$0xff] (!%p210_p10)  ;;  %v302_v19 = vld [vmem:[%s1357_s2 + $0x48] sm:$0xff] (!%p210_p10)  ;;  %v303_v20 = vld [vmem:[%s1357_s2 + $0x50] sm:$0xff] (!%p210_p10) }
  0x13   : > { %v968_v21 = vld [vmem:[%s1356_s1 + $0x10] sm:$0xff] (!%p210_p10)   ;;  %v304_v23 = vld [vmem:[%s1357_s2 + $0x58] sm:$0xff] (!%p210_p10)  ;;  %v305_v24 = vld [vmem:[%s1357_s2 + $0x60] sm:$0xff] (!%p210_p10) }
  0x14   : > { %v969_v22 = vld [vmem:[%s1356_s1 + $0x30] sm:$0xff] (!%p210_p10)   ;;  %v306_v25 = vld [vmem:[%s1357_s2 + $0x68] sm:$0xff] (!%p210_p10)  ;;  %v970_v27 = vld [vmem:[%s1356_s1 + $0x18] sm:$0xff] (!%p210_p10)  }
  0x15   : > { %316 = vperm.xlu0 (!%p210_p10), %961, %v294_v8   ;;  %326 = vperm.xlu1 (!%p210_p10), %962, %v296_v11   ;;  %v307_v26 = vld [vmem:[%s1357_s2 + $0x70] sm:$0xff] (!%p210_p10)  ;;  %v971_v28 = vld [vmem:[%s1356_s1 + $0x38] sm:$0xff] (!%p210_p10)  }
  0x16   : > { %s242_s7 = scalar_select %p241_p11, %s1042_s21, 1  ;;  %v308_v29 = vld [vmem:[%s1357_s2 + $0x78] sm:$0xff] }
  0x17   : > { %s1053_s21 = smov [#allocation3]  }
  0x18   : > { %s902_s8 = sshll.u32 %s242_s7, 3  ;;  %s806_s7 = sshll.u32 %s239_s29, 4  ;;  %s1310_s7 = int_to_ptr.vmem [resolvable:$true] %s806_s7 }
  0x19   : > { %s248_s11 = scalar_lea.vmem %s1355_s0, %s902_s8  ;;  %331 = vperm.xlu0 %961, %v297_v12   ;;  %336 = vperm.xlu1 %962, %v298_v13   ;;  %s972_s12 = scalar_lea.vmem %s1310_s7, 16 }
  0x1a   : > { %v271_v1 = vld [vmem:[%s248_s11] sm:$0xff]  ;;  %s794_s11 = scalar_lea.sflag [#allocation4], %s238_s17  ;;  %p973_p12 = scmp.ne.s32.totalorder %s1310_s7, %s972_s12 }
  0x1b   : > { %v273_v2 = vcombine.high %v271_v1, %v271_v1  ;;  %v275_v3 = vpack.c.bf16 %v271_v1, %v271_v1  ;;  %s976_s13 = sshll.u32 %s1053_s21, 4  ;;  %s977_s13 = int_to_ptr.vmem [resolvable:$false] %s976_s13 }
  0x1c   : > { %p974_p13 = pnand %p973_p12, %p1124_p4  ;;  %s978_s14 = scalar_lea.vmem %s977_s13, 32 }
  0x1d   : > { %v276_v5 = vpack.c.bf16 %v273_v2, %v273_v2  ;;  %v456_v6 = vsel %vm454_vm0, %v275_v3, 0  ;;  %341 = vperm.xlu0 %961, %v299_v14   ;;  %346 = vperm.xlu1 %962, %v300_v17   ;;  %p979_p1 = scmp.lt.s32.totalorder %s1310_s7, %s977_s13  ;;  %p980_p2 = scmp.lt.s32.totalorder %s978_s14, %s972_s12 }
  0x1e   : > { %p975_p0 = pneg %p974_p13 }
  0x1f   : > { %890 = vmatprep.subr.msk.bf16.mxu0 %vm454_vm0, %v276_v5  ;;  %903 = vmatprep.subr.msk.bf16.mxu1 %vm454_vm0, %v276_v5  ;;  %p981_p3 = por %p980_p2, %p979_p1 }
  0x20   : > { %462 = vmatpush1.bf16.msra.mxu0 %v456_v6  ;;  %904 = vmatpush1.bf16.msra.mxu1 %v456_v6 }
  0x21   : > { %351 = vperm.xlu0 %961, %v301_v18   ;;  %356 = vperm.xlu1 %962, %v302_v19   ;;  %p982_p5 = pnand %p981_p3, %p975_p0 }
  0x23   : > { %891 = vmatmul.mubr.msk.bf16.vlgmr.msra.gmra.mrb[0].mxu0 %vm429_vm1, %v964_v9  ;;  %895 = vmatmul.mubr.msk.bf16.vlgmr.msra.gmra.mrb[0].mxu1 %vm429_vm1, %v965_v10 }
  0x24   : > { %503 = vmatprep.mubr.bf16.mxu0 %v1052_v0  ;;  %543 = vmatprep.mubr.bf16.mxu1 %v1052_v0 }
  0x25   : > { %361 = vperm.xlu0 %961, %v303_v20   ;;  %366 = vperm.xlu1 %962, %v304_v23  }
  0x29   : > { %371 = vperm.xlu0 %961, %v305_v24   ;;  %376 = vperm.xlu1 %962, %v306_v25  }
  0x2b   : > { %892 = vmatmul.mubr.msk.bf16.gmra.mrb[4].mxu0 %vm429_vm1, %v966_v15  ;;  %896 = vmatmul.mubr.msk.bf16.gmra.mrb[4].mxu1 %vm429_vm1, %v967_v16 }
  0x2c   : > { %513 = vmatprep.mubr.bf16.mxu0 %v1052_v0  ;;  %553 = vmatprep.mubr.bf16.mxu1 %v1052_v0 }
  0x2d   : > { %381 = vperm.xlu0 %961, %v307_v26   ;;  %386 = vperm.xlu1 %962, %v308_v29  }
  0x33   : > { %893 = vmatmul.mubr.msk.bf16.gmra.mrb[8].mxu0 %vm429_vm1, %v968_v21  ;;  %897 = vmatmul.mubr.msk.bf16.gmra.mrb[8].mxu1 %vm429_vm1, %v969_v22 }
  0x34   : > { %523 = vmatprep.mubr.bf16.mxu0 %v1052_v0  ;;  %563 = vmatprep.mubr.bf16.mxu1 %v1052_v0 }
  0x3b   : > { %894 = vmatmul.mubr.msk.bf16.gmra.mrb[12].mxu0 %vm429_vm1, %v970_v27  ;;  %898 = vmatmul.mubr.msk.bf16.gmra.mrb[12].mxu1 %vm429_vm1, %v971_v28 }
  0x90   : > { %v312_v30 = vpop.permute.xlu0 %311  ;;  %v322_v31 = vpop.permute.xlu1 %321 }
  0x94   : > { %v317_v32 = vpop.permute.xlu0 %316  ;;  %v327_v33 = vpop.permute.xlu1 %326 }
  0x98   : > { %v1224_v34 = vpop.permute.xlu0 %331  ;;  %v1226_v35 = vpop.permute.xlu1 %336 }
  0x9c   : > { %v1228_v36 = vpop.permute.xlu0 %341  ;;  %v1230_v37 = vpop.permute.xlu1 %346 }
  0xa0   : > { %v352_v38 = vpop.permute.xlu0 %351  ;;  %v357_v39 = vpop.permute.xlu1 %356 }
  0xa4   : > { %v362_v2 = vpop.permute.xlu0 %361  ;;  %v367_v3 = vpop.permute.xlu1 %366 }
  0xf6   : > { %v495_v40 = vpop.f32.mrb[0].mxu0  ;;  %v535_v41 = vpop.f32.mrb[0].mxu1 }
  0xf7   : > { %v496_v42 = vadd.f32 %v495_v40, %v312_v30  ;;  %v497_v43 = vpop.f32.mrb[1].mxu0  ;;  %v536_v44 = vadd.f32 %v535_v41, %v352_v38  ;;  %v537_v45 = vpop.f32.mrb[1].mxu1 }
  0xf8   : > { %v498_v46 = vadd.f32 %v497_v43, %v312_v30  ;;  %v499_v47 = vpop.f32.mrb[2].mxu0  ;;  %v538_v48 = vadd.f32 %v537_v45, %v352_v38  ;;  %v539_v49 = vpop.f32.mrb[2].mxu1 }
  0xf9   : > { %v574_v50 = vmax.f32 %v496_v42, 0.0  ;;  %v500_v51 = vadd.f32 %v499_v47, %v317_v32  ;;  %v501_v52 = vpop.f32.mrb[3].mxu0  ;;  %v590_v53 = vmax.f32 %v536_v44, 0.0  ;;  %v540_v54 = vadd.f32 %v539_v49, %v357_v39  ;;  %v541_v55 = vpop.f32.mrb[3].mxu1 }
  0xfa   : > { %v575_v56 = vmax.f32 %v498_v46, 0.0  ;;  %v502_v57 = vadd.f32 %v501_v52, %v317_v32  ;;  %v591_v58 = vmax.f32 %v538_v48, 0.0  ;;  %v542_v59 = vadd.f32 %v541_v55, %v357_v39  ;;  %v372_v32 = vpop.permute.xlu0 %371  ;;  %v377_v38 = vpop.permute.xlu1 %376 }
  0xfb   : > { %v576_v60 = vmax.f32 %v500_v51, 0.0  ;;  %v592_v61 = vmax.f32 %v540_v54, 0.0 }
  0xfc   : > { %v577_v62 = vmax.f32 %v502_v57, 0.0  ;;  %v638_v63 = vadd.f32 %v575_v56, %v574_v50  ;;  %v593_v0 = vmax.f32 %v542_v59, 0.0  ;;  %v1232_v1 = vadd.f32 %v591_v58, %v590_v53 }
  0xfe   : > { %v505_v4 = vpop.f32.mrb[4].mxu0  ;;  %689 = vadd.xlane.f32.xlu0 %v638_v63  ;;  %v545_v5 = vpop.f32.mrb[4].mxu1  ;;  %v639_v6 = vadd.f32 %v577_v62, %v576_v60  ;;  %v1234_v7 = vadd.f32 %v593_v0, %v592_v61 }
  0xff   : > { %v506_v8 = vadd.f32 %v505_v4, %v322_v31  ;;  %v507_v9 = vpop.f32.mrb[5].mxu0  ;;  %v546_v10 = vadd.f32 %v545_v5, %v362_v2  ;;  %v547_v11 = vpop.f32.mrb[5].mxu1 }
 0x100   : > { %v508_v12 = vadd.f32 %v507_v9, %v322_v31  ;;  %v509_v13 = vpop.f32.mrb[6].mxu0  ;;  %691 = vadd.xlane.f32.xlu1 %v639_v6  ;;  %v548_v14 = vadd.f32 %v547_v11, %v362_v2  ;;  %v549_v15 = vpop.f32.mrb[6].mxu1 }
 0x101   : > { %v578_v16 = vmax.f32 %v506_v8, 0.0  ;;  %v510_v17 = vadd.f32 %v509_v13, %v327_v33  ;;  %v594_v18 = vmax.f32 %v546_v10, 0.0  ;;  %v511_v19 = vpop.f32.mrb[7].mxu0  ;;  %v550_v20 = vadd.f32 %v549_v15, %v367_v3  ;;  %v551_v21 = vpop.f32.mrb[7].mxu1 }
 0x102   : > { %v579_v22 = vmax.f32 %v508_v12, 0.0  ;;  %v512_v23 = vadd.f32 %v511_v19, %v327_v33  ;;  %v595_v24 = vmax.f32 %v548_v14, 0.0  ;;  %v552_v25 = vadd.f32 %v551_v21, %v367_v3  ;;  %v382_v2 = vpop.permute.xlu0 %381  ;;  %v387_v3 = vpop.permute.xlu1 %386 }
 0x103   : > { %v580_v26 = vmax.f32 %v510_v17, 0.0  ;;  %v596_v27 = vmax.f32 %v550_v20, 0.0 }
 0x104   : > { %v581_v28 = vmax.f32 %v512_v23, 0.0  ;;  %v597_v29 = vmax.f32 %v552_v25, 0.0  ;;  %v640_v30 = vadd.f32 %v579_v22, %v578_v16  ;;  %v1236_v31 = vadd.f32 %v595_v24, %v594_v18 }
 0x106   : > { %v515_v39 = vpop.f32.mrb[8].mxu0  ;;  %v555_v40 = vpop.f32.mrb[8].mxu1  ;;  %693 = vadd.xlane.f32.xlu0 %v640_v30  ;;  %v641_v41 = vadd.f32 %v581_v28, %v580_v26  ;;  %v1238_v42 = vadd.f32 %v597_v29, %v596_v27 }
 0x107   : > { %v516_v43 = vadd.f32 %v515_v39, %v1224_v34  ;;  %v556_v33 = vadd.f32 %v555_v40, %v372_v32  ;;  %v517_v44 = vpop.f32.mrb[9].mxu0  ;;  %v557_v45 = vpop.f32.mrb[9].mxu1 }
 0x108   : > { %v518_v46 = vadd.f32 %v517_v44, %v1224_v34  ;;  %v558_v47 = vadd.f32 %v557_v45, %v372_v32  ;;  %v519_v48 = vpop.f32.mrb[10].mxu0  ;;  %v559_v49 = vpop.f32.mrb[10].mxu1 }
 0x109   : > { %v582_v50 = vmax.f32 %v516_v43, 0.0  ;;  %v598_v51 = vmax.f32 %v556_v33, 0.0  ;;  %v520_v52 = vadd.f32 %v519_v48, %v1226_v35  ;;  %v560_v53 = vadd.f32 %v559_v49, %v377_v38  ;;  %v521_v54 = vpop.f32.mrb[11].mxu0  ;;  %v561_v55 = vpop.f32.mrb[11].mxu1  ;;  %v738_v43 = vld [vmem:[%s1358_s3 + $0x8] sm:$0xff]  ;;  %v741_v49 = vld [vmem:[%s1358_s3 + $0x20] sm:$0xff] }
 0x10a   : > { %v583_v56 = vmax.f32 %v518_v46, 0.0  ;;  %v599_v57 = vmax.f32 %v558_v47, 0.0  ;;  %v522_v58 = vadd.f32 %v521_v54, %v1226_v35  ;;  %v562_v59 = vadd.f32 %v561_v55, %v377_v38  ;;  %695 = vadd.xlane.f32.xlu0 %v641_v41  ;;  %v740_v46 = vld [vmem:[%s1358_s3 + $0x18] sm:$0xff] }
 0x10b   : > { %v584_v60 = vmax.f32 %v520_v52, 0.0  ;;  %v600_v61 = vmax.f32 %v560_v53, 0.0 }
 0x10c   : > { %v585_v62 = vmax.f32 %v522_v58, 0.0  ;;  %v601_v34 = vmax.f32 %v562_v59, 0.0  ;;  %v642_v63 = vadd.f32 %v583_v56, %v582_v50  ;;  %v650_v0 = vadd.f32 %v599_v57, %v598_v51  ;;  %v742_v58 = vld [vmem:[%s1358_s3 + $0x28] sm:$0xff] }
 0x10e   : > { %v525_v4 = vpop.f32.mrb[12].mxu0  ;;  %v565_v5 = vpop.f32.mrb[12].mxu1  ;;  %697 = vadd.xlane.f32.xlu1 %v642_v63  ;;  %v643_v6 = vadd.f32 %v585_v62, %v584_v60  ;;  %v651_v8 = vadd.f32 %v601_v34, %v600_v61  ;;  %v743_v62 = vld [vmem:[%s1358_s3 + $0x30] sm:$0xff] }
 0x10f   : > { %v526_v9 = vadd.f32 %v525_v4, %v1228_v36  ;;  %v566_v10 = vadd.f32 %v565_v5, %v382_v2  ;;  %v527_v11 = vpop.f32.mrb[13].mxu0  ;;  %v567_v35 = vpop.f32.mrb[13].mxu1 }
 0x110   : > { %v528_v12 = vadd.f32 %v527_v11, %v1228_v36  ;;  %v568_v13 = vadd.f32 %v567_v35, %v382_v2  ;;  %v529_v14 = vpop.f32.mrb[14].mxu0  ;;  %v569_v15 = vpop.f32.mrb[14].mxu1  ;;  %699 = vadd.xlane.f32.xlu0 %v643_v6  ;;  %v745_v6 = vld [vmem:[%s1358_s3 + $0x40] sm:$0xff]  ;;  %v746_v35 = vld [vmem:[%s1358_s3 + $0x48] sm:$0xff] }
 0x111   : > { %v586_v16 = vmax.f32 %v526_v9, 0.0  ;;  %v602_v17 = vmax.f32 %v566_v10, 0.0  ;;  %v530_v18 = vadd.f32 %v529_v14, %v1230_v37  ;;  %v570_v19 = vadd.f32 %v569_v15, %v387_v3  ;;  %v531_v20 = vpop.f32.mrb[15].mxu0  ;;  %v571_v21 = vpop.f32.mrb[15].mxu1 }
 0x112   : > { %v587_v22 = vmax.f32 %v528_v12, 0.0  ;;  %v603_v23 = vmax.f32 %v568_v13, 0.0  ;;  %v532_v24 = vadd.f32 %v531_v20, %v1230_v37  ;;  %v572_v25 = vadd.f32 %v571_v21, %v387_v3  ;;  %v748_v21 = vld [vmem:[%s1358_s3 + $0x58] sm:$0xff] }
 0x113   : > { %v588_v26 = vmax.f32 %v530_v18, 0.0  ;;  %v604_v27 = vmax.f32 %v570_v19, 0.0 }
 0x114   : > { %v589_v28 = vmax.f32 %v532_v24, 0.0  ;;  %v605_v36 = vmax.f32 %v572_v25, 0.0  ;;  %v644_v29 = vadd.f32 %v587_v22, %v586_v16  ;;  %v652_v30 = vadd.f32 %v603_v23, %v602_v17  ;;  %v747_v16 = vld [vmem:[%s1358_s3 + $0x50] sm:$0xff] }
 0x116   : > { %701 = vadd.xlane.f32.xlu1 %v644_v29  ;;  %v645_v32 = vadd.f32 %v589_v28, %v588_v26  ;;  %v653_v38 = vadd.f32 %v605_v36, %v604_v27  ;;  %v749_v26 = vld [vmem:[%s1358_s3 + $0x60] sm:$0xff] }
 0x118   : > { %703 = vadd.xlane.f32.xlu0 %v645_v32 }
 0x11a   : > { %705 = vadd.xlane.f32.xlu1 %v1232_v1 }
 0x11c   : > { %707 = vadd.xlane.f32.xlu0 %v1234_v7  ;;  %v737_v7 = vld [vmem:[%s1358_s3] sm:$0xff] }
 0x11e   : > { %709 = vadd.xlane.f32.xlu1 %v1236_v31  ;;  %v739_v31 = vld [vmem:[%s1358_s3 + $0x10] sm:$0xff] }
 0x120   : > { %711 = vadd.xlane.f32.xlu0 %v1238_v42 }
 0x122   : > { %713 = vadd.xlane.f32.xlu1 %v650_v0  ;;  %v744_v0 = vld [vmem:[%s1358_s3 + $0x38] sm:$0xff] }
 0x124   : > { %715 = vadd.xlane.f32.xlu0 %v651_v8 }
 0x126   : > { %717 = vadd.xlane.f32.xlu1 %v652_v30  ;;  %v750_v30 = vld [vmem:[%s1358_s3 + $0x68] sm:$0xff] }
 0x128   : > { %719 = vadd.xlane.f32.xlu0 %v653_v38 }
 0x18b   : > { %v690_v37 = vpop.xlane.xlu0 %689 }
 0x18c   : > { %v721_v33 = vmul.f32 0.00390625, %v690_v37 }
 0x18d   : > { %v692_v39 = vpop.xlane.xlu1 %691 }
 0x18e   : > { %v722_v41 = vmul.f32 0.00390625, %v692_v39  ;;  %v753_v47 = vmul.f32 %v737_v7, %v721_v33  ;;  %v752_v7 = vld [vmem:[%s1358_s3 + $0x78] sm:$0xff] }
 0x190   : > { %v754_v44 = vmul.f32 %v738_v43, %v722_v41 }
 0x192   : > { %v769_v51 = vadd.f32 %v754_v44, %v753_v47 }
 0x193   : > { %v694_v40 = vpop.xlane.xlu0 %693 }
 0x194   : > { %v723_v1 = vmul.f32 0.00390625, %v694_v40  ;;  %v751_v40 = vld [vmem:[%s1358_s3 + $0x70] sm:$0xff] }
 0x196   : > { %v755_v48 = vmul.f32 %v739_v31, %v723_v1 }
 0x197   : > { %v696_v42 = vpop.xlane.xlu0 %695 }
 0x198   : > { %v724_v45 = vmul.f32 0.00390625, %v696_v42  ;;  %v770_v55 = vadd.f32 %v769_v51, %v755_v48 }
 0x19a   : > { %v756_v52 = vmul.f32 %v740_v46, %v724_v45 }
 0x19b   : > { %v698_v50 = vpop.xlane.xlu1 %697 }
 0x19c   : > { %v725_v53 = vmul.f32 0.00390625, %v698_v50  ;;  %v771_v59 = vadd.f32 %v770_v55, %v756_v52 }
 0x19d   : > { %v700_v54 = vpop.xlane.xlu0 %699 }
 0x19e   : > { %v757_v56 = vmul.f32 %v741_v49, %v725_v53  ;;  %v726_v57 = vmul.f32 0.00390625, %v700_v54  ;;  %v790_v54 = vld [vmem:[%s1359_s4] sm:$0x1] }
 0x1a0   : > { %v772_v60 = vadd.f32 %v771_v59, %v757_v56  ;;  %v758_v61 = vmul.f32 %v742_v58, %v726_v57 }
 0x1a2   : > { %v773_v3 = vadd.f32 %v772_v60, %v758_v61 }
 0x1a3   : > { %v702_v34 = vpop.xlane.xlu1 %701 }
 0x1a4   : > { %v727_v63 = vmul.f32 0.00390625, %v702_v34 }
 0x1a5   : > { %v704_v2 = vpop.xlane.xlu0 %703 }
 0x1a6   : > { %v759_v4 = vmul.f32 %v743_v62, %v727_v63  ;;  %v728_v5 = vmul.f32 0.00390625, %v704_v2 }
 0x1a7   : > { %v706_v8 = vpop.xlane.xlu1 %705 }
 0x1a8   : > { %v774_v9 = vadd.f32 %v773_v3, %v759_v4  ;;  %v760_v10 = vmul.f32 %v744_v0, %v728_v5  ;;  %v729_v11 = vmul.f32 0.00390625, %v706_v8 }
 0x1a9   : > { %v708_v12 = vpop.xlane.xlu0 %707 }
 0x1aa   : > { %v775_v13 = vadd.f32 %v774_v9, %v760_v10  ;;  %v761_v14 = vmul.f32 %v745_v6, %v729_v11  ;;  %v730_v15 = vmul.f32 0.00390625, %v708_v12 }
 0x1ab   : > { %v710_v17 = vpop.xlane.xlu1 %709 }
 0x1ac   : > { %v776_v18 = vadd.f32 %v775_v13, %v761_v14  ;;  %v762_v19 = vmul.f32 %v746_v35, %v730_v15  ;;  %v731_v20 = vmul.f32 0.00390625, %v710_v17 }
 0x1ad   : > { %v712_v22 = vpop.xlane.xlu0 %711 }
 0x1ae   : > { %v777_v23 = vadd.f32 %v776_v18, %v762_v19  ;;  %v763_v24 = vmul.f32 %v747_v16, %v731_v20  ;;  %v732_v25 = vmul.f32 0.00390625, %v712_v22 }
 0x1af   : > { %v714_v27 = vpop.xlane.xlu1 %713 }
 0x1b0   : > { %v778_v28 = vadd.f32 %v777_v23, %v763_v24  ;;  %v764_v36 = vmul.f32 %v748_v21, %v732_v25  ;;  %v733_v29 = vmul.f32 0.00390625, %v714_v27 }
 0x1b1   : > { %v716_v32 = vpop.xlane.xlu0 %715 }
 0x1b2   : > { %v779_v38 = vadd.f32 %v778_v28, %v764_v36  ;;  %v765_v37 = vmul.f32 %v749_v26, %v733_v29  ;;  %v734_v39 = vmul.f32 0.00390625, %v716_v32 }
 0x1b3   : > { %v718_v41 = vpop.xlane.xlu1 %717 }
 0x1b4   : > { %v780_v43 = vadd.f32 %v779_v38, %v765_v37  ;;  %v766_v33 = vmul.f32 %v750_v30, %v734_v39  ;;  %v735_v1 = vmul.f32 0.00390625, %v718_v41 }
 0x1b5   : > { %v720_v31 = vpop.xlane.xlu0 %719 }
 0x1b6   : > { %v781_v42 = vadd.f32 %v780_v43, %v766_v33  ;;  %v767_v44 = vmul.f32 %v751_v40, %v735_v1  ;;  %v736_v45 = vmul.f32 0.00390625, %v720_v31 }
 0x1b8   : > { %v782_v46 = vadd.f32 %v781_v42, %v767_v44  ;;  %v768_v47 = vmul.f32 %v752_v7, %v736_v45 }
 0x1ba   : > { %v783_v48 = vadd.f32 %v782_v46, %v768_v47 }
 0x1bc   : > { %v784_v49 = vrot.slane %v783_v48, 4 }
 0x1be   : > { %v785_v50 = vadd.f32 %v784_v49, %v783_v48 }
 0x1c0   : > { %v786_v51 = vrot.slane %v785_v50, 2 }
 0x1c2   : > { %v787_v52 = vadd.f32 %v786_v51, %v785_v50 }
 0x1c4   : > { %v788_v53 = vrot.slane %v787_v52, 1 }
 0x1c6   : > { %v789_v55 = vadd.f32 %v788_v53, %v787_v52 }
 0x1c8   : > { %v791_v56 = vadd.f32 %v790_v54, %v789_v55 }
 0x1ca   : > { %792 = vst [vmem:[%s239_s29] sm:$0x1] %v791_v56 }
 0x1cb   : > { %985 = shalt.err (!%p982_p5)
}
 0x1cc   : > { %s986_s15 = scalar_lea.hbm %s1308_s10, 16  ;;  %s990_s24 = scalar_lea.hbm %s1360_s5, 32 }
 0x1cd   : > { %p987_p6 = scmp.ne.s32.totalorder %s1308_s10, %s986_s15  ;;  %p991_p10 = scmp.lt.u32.totalorder %s1308_s10, %s1360_s5 }
 0x1ce   : > { %p992_p11 = scmp.lt.u32.totalorder %s990_s24, %s986_s15  ;;  %p994_p13 = scmp.lt.u32.totalorder %s986_s15, %s1308_s10 }
 0x1cf   : > { %p988_p7 = pnand %p987_p6, %p1124_p4 }
 0x1d0   : > { %p993_p12 = por %p992_p11, %p991_p10 }
 0x1d1   : > { %p989_p9 = pneg %p988_p7 }
 0x1d2   : > { %p995_p0 = por %p994_p13, %p993_p12 }
 0x1d4   : > { %p996_p1 = pnand %p995_p0, %p989_p9 }
 0x1d6   : > { %999 = shalt.err (!%p996_p1)
}
 0x1d7   : > { %905 = dma.vmem_to_hbm [thread:$0]  (%p1124_p4), %s1310_s7, 16, %s1308_s10, %s794_s11  }
 0x1d8 PF: > { %p911_p2 = scmp.ge.s32.totalorder %s1050_s23, 2  ;;  %s818_s29 = sand.u32 1, %s1030_s18  }
 0x1d9   : > { %s819_s8 = scalar_lea.sflag [#allocation4], %s818_s29 }
 0x1da   : > { %p908_p3 = pnand %p911_p2, %p1131_p8 }
 0x1dc   : > { %1025 = dma.done.wait (!%p908_p3), %s819_s8, 16  }
 0x1dd   : > { %1027 = vsyncadd (!%p908_p3), %s819_s8, 4294967280  ;;  %s18_s23 = sadd.s32 1, %s1050_s23   ;;  %s1363_s18 = smov %s1034_s19 }
 0x1de   : > { %p15_p5 = scmp.ge.s32.totalorder %s18_s23, 4   ;;  %s1364_s19 = smov %s1038_s20 }
 0x1df   : > { %s1365_s20 = smov %s1137_s6  ;;  %s1366_s21 = smov %s1046_s22 }
 0x1e0   : > { %s1367_s22 = smov %s1369_s26  ;;  %17 = sbr.rel (!%p15_p5) target bundleno = 4 (0x4), region = 83 }
 0x1e7   :  { %823 = vsyncpa [#allocation4], 1 }
 0x1e8   :  { %825 = vsyncpa [#allocation4 + $0x1], 1 }

</bundles_post_ra>
